<compile_context>
chip_gen: v5e
topology: v5e:2x2
jax: 0.10.0
libtpu: 0.0.40
codegen_flags: <defaults>
</compile_context>

<pallas_src>
import functools
import math

import numpy as np
import jax
import jax.numpy as jnp
from jax.experimental import pallas as pl
from jax.experimental.pallas import tpu as pltpu

ALPHA = 1e-06
_TARGET_TILE_BYTES = 4 * 1024 * 1024   # per-buffer tile target
_VMEM_LIMIT_BYTES = 48 * 1024 * 1024   # 6 double-buffered tiles + headroom (< v7x 64 MiB)


def _cdiv(a, b):
    return -(-a // b)


def _round_up(a, b):
    return _cdiv(a, b) * b


def _transform_kernel(x_ref, u_ref, scale_ref, out_ref):
    """Elementwise dequantize + logit transform on one lane-dense tile.

    x_ref     : (tb, tl) f32 input tile (lane-dense view of (B, F))
    u_ref     : (tb, tl) f32 sigmoid(gaussian) dequantization noise
    scale_ref : (1,  tl) f32 = (1 - 2*ALPHA)/divider on categorical lanes, 0 elsewhere
    out_ref   : (tb, tl) f32 output tile
    """
    x = x_ref[...]
    scale = scale_ref[...]                      # broadcasts (1, tl) -> (tb, tl)

    # _dequantize + _logit_transform with the ALPHA affine folded into `scale`:
    #   t = ALPHA + (1 - 2*ALPHA) * (x + u) / d  ==  (x + u) * scale + ALPHA
    t = (x + u_ref[...]) * scale + ALPHA
    logit = jnp.log(t / (1.0 - t))

    # Non-categorical lanes (scale == 0) pass through unchanged.
    out_ref[...] = jnp.where(scale > 0.0, logit, x)


@functools.partial(jax.jit, static_argnums=(2, 3))
def categorical_transform_forward(x, key, dividers, feature_indices=None):
    """JAX wrapper mirroring TorchCategoricalTransformer.forward.

    x               : (B, F) fp32
    key             : jax.random PRNG key for the dequantization noise
    dividers        : tuple[int]   category counts per categorical feature
    feature_indices : tuple[int] or None (None -> all features categorical)
    """
    B, F = x.shape
    x = x.astype(jnp.float32)
    if feature_indices is None:
        feature_indices = tuple(range(len(dividers)))

    # sigmoid(randn) noise drawn wrapper-side (fuses into one XLA elementwise
    # op) so the Pallas kernel is portable across HW and interpret mode.
    # TODO(synk): on real TPU HW this stream could be generated in-kernel with
    # pltpu.prng_seed / pltpu.stateful_normal to drop a full (B, F) HBM input.
    u = jax.nn.sigmoid(jax.random.normal(key, (B, F), dtype=jnp.float32))

    # Per-column constant: (1 - 2*ALPHA)/divider on categorical lanes, else 0.
    scale_col = np.zeros((F,), np.float32)
    for d, idx in zip(dividers, feature_indices):
        scale_col[idx] = (1.0 - 2.0 * ALPHA) / float(d)

    # Lane densification: (B, F) -> (R, LW) row-major, LW = k*F multiple of 128,
    # so vreg lanes are fully used and output stores are unmasked.
    k = 128 // math.gcd(F, 128)
    LW = k * F
    R = _cdiv(B, k)
    B_pad = R * k
    if B_pad != B:
        # Only when B is not a multiple of k: pad a < k-row batch tail.
        # TODO(synk): handle the tail with a tiny second kernel to avoid the copy.
        x = jnp.pad(x, ((0, B_pad - B), (0, 0)))
        u = jnp.pad(u, ((0, B_pad - B), (0, 0)))
    x_d = x.reshape(R, LW)      # contiguous row-major reshape: no HBM copy
    u_d = u.reshape(R, LW)
    scale = jnp.asarray(np.tile(scale_col, k)[None, :])      # (1, LW) constant

    # Tile sizing: ~4 MiB per buffer.  The lane axis is tiled too (guards the
    # k blow-up for awkward F); the row grid is split into >= 2 steps when
    # possible so v7x can shard the "parallel" axis across both TensorCores.
    lane_cap = max(128, (_TARGET_TILE_BYTES // (8 * 4) // 128) * 128)
    tl = min(LW, lane_cap)
    rows_cap = max(8, (_TARGET_TILE_BYTES // (tl * 4) // 8) * 8)
    if R <= rows_cap:
        tb = _round_up(_cdiv(R, 2), 8) if R >= 16 else R
    else:
        tb = rows_cap
    grid = (_cdiv(R, tb), _cdiv(LW, tl))      # non-divisible edges are masked

    tile_spec = pl.BlockSpec((tb, tl), lambda i, j: (i, j))
    out_dense = pl.pallas_call(
        _transform_kernel,
        out_shape=jax.ShapeDtypeStruct((R, LW), jnp.float32),
        grid=grid,
        in_specs=[tile_spec, tile_spec,
                  pl.BlockSpec((1, tl), lambda i, j: (0, j))],
        out_specs=tile_spec,
        compiler_params=pltpu.CompilerParams(
            dimension_semantics=("parallel", "parallel"),
            vmem_limit_bytes=_VMEM_LIMIT_BYTES,
        ),
    )(x_d, u_d, scale)

    out = out_dense.reshape(B_pad, F)
    return out if B_pad == B else out[:B]


def _reference_forward(x, key, dividers, feature_indices):
    """Pure-JAX reference using the SAME noise stream as the wrapper."""
    B, F = x.shape
    if feature_indices is None:
        feature_indices = tuple(range(len(dividers)))
    u = jax.nn.sigmoid(jax.random.normal(key, (B, F), dtype=jnp.float32))
    out = x.astype(jnp.float32)
    for d, j in zip(dividers, feature_indices):
        deq = (x[:, j] + u[:, j]) / float(d)
        t = ALPHA + (1.0 - 2.0 * ALPHA) * deq
        out = out.at[:, j].set(jnp.log(t / (1.0 - t)))
    return out


if __name__ == "__main__":
    root = jax.random.PRNGKey(0)
    k_x1, k_n1, k_x2, k_n2 = jax.random.split(root, 4)

    # Case 1: mixed categorical / continuous columns.
    B, F = 8, 8
    dividers = (3, 5, 4)
    feature_indices = (0, 2, 5)
    x = jax.random.uniform(k_x1, (B, F), jnp.float32)
    for d, idx in zip(dividers, feature_indices):
        cats = jax.random.randint(jax.random.fold_in(k_x1, idx), (B,), 0, d)
        x = x.at[:, idx].set(cats.astype(jnp.float32))

    out = jax.block_until_ready(
        categorical_transform_forward(x, k_n1, dividers, feature_indices))
    ref = _reference_forward(x, k_n1, dividers, feature_indices)
    assert out.shape == (B, F) and out.dtype == jnp.float32
    assert bool(jnp.all(jnp.isfinite(out))), "non-finite output"
    assert bool(jnp.allclose(out, ref, rtol=1e-5, atol=1e-5)), \
        f"max |diff| = {float(jnp.max(jnp.abs(out - ref)))}"

    # Case 2: all columns categorical (feature_indices=None).
    B2, F2 = 32, 5
    dividers2 = (2, 3, 4, 5, 6)
    cols = [jax.random.randint(jax.random.fold_in(k_x2, j), (B2,), 0, d)
            for j, d in enumerate(dividers2)]
    x2 = jnp.stack(cols, axis=1).astype(jnp.float32)

    out2 = jax.block_until_ready(
        categorical_transform_forward(x2, k_n2, dividers2, None))
    ref2 = _reference_forward(x2, k_n2, dividers2, None)
    assert out2.shape == (B2, F2) and bool(jnp.all(jnp.isfinite(out2)))
    assert bool(jnp.allclose(out2, ref2, rtol=1e-5, atol=1e-5)), \
        f"max |diff| = {float(jnp.max(jnp.abs(out2 - ref2)))}"

    print("KERNEL_OK")
</pallas_src>

<mosaic_0001>
module attributes {stable_mosaic.version = 11 : i64} {
  func.func @_transform_kernel(%arg0: i32, %arg1: i32, %arg2: memref<1x128xf32, #tpu.memory_space<vmem>>, %arg3: memref<1x128xf32, #tpu.memory_space<vmem>>, %arg4: memref<1x128xf32, #tpu.memory_space<vmem>>, %arg5: memref<1x128xf32, #tpu.memory_space<vmem>>) attributes {dimension_semantics = [#tpu.dimension_semantics<parallel>, #tpu.dimension_semantics<parallel>], iteration_bounds = array<i64: 1, 1>, scalar_prefetch = 0 : i64, scratch_operands = 0 : i64, tpu.core_type = #tpu.core_type<tc>, window_params = [{transform_indices = @transform_0, window_bounds = array<i64: 1, 128>}, {transform_indices = @transform_1, window_bounds = array<i64: 1, 128>}, {transform_indices = @transform_2, window_bounds = array<i64: 1, 128>}, {transform_indices = @transform_3, window_bounds = array<i64: 1, 128>}]} {
    %c0 = arith.constant 0 : index
    %c0_0 = arith.constant 0 : index
    %0 = vector.load %arg2[%c0, %c0_0] : memref<1x128xf32, #tpu.memory_space<vmem>>, vector<1x128xf32>
    %c0_1 = arith.constant 0 : index
    %c0_2 = arith.constant 0 : index
    %1 = vector.load %arg4[%c0_1, %c0_2] : memref<1x128xf32, #tpu.memory_space<vmem>>, vector<1x128xf32>
    %c0_3 = arith.constant 0 : index
    %c0_4 = arith.constant 0 : index
    %2 = vector.load %arg3[%c0_3, %c0_4] : memref<1x128xf32, #tpu.memory_space<vmem>>, vector<1x128xf32>
    %3 = arith.addf %0, %2 : vector<1x128xf32>
    %4 = arith.mulf %3, %1 : vector<1x128xf32>
    %cst = arith.constant 9.99999997E-7 : f32
    %5 = vector.broadcast %cst : f32 to vector<1x128xf32>
    %6 = arith.addf %4, %5 : vector<1x128xf32>
    %cst_5 = arith.constant 1.000000e+00 : f32
    %7 = vector.broadcast %cst_5 : f32 to vector<1x128xf32>
    %8 = arith.subf %7, %6 : vector<1x128xf32>
    %9 = arith.divf %6, %8 : vector<1x128xf32>
    %10 = math.log %9 : vector<1x128xf32>
    %cst_6 = arith.constant 0.000000e+00 : f32
    %11 = vector.broadcast %cst_6 : f32 to vector<1x128xf32>
    %12 = arith.cmpf ogt, %1, %11 : vector<1x128xf32>
    %13 = arith.select %12, %10, %0 : vector<1x128xi1>, vector<1x128xf32>
    %c0_7 = arith.constant 0 : index
    %c0_8 = arith.constant 0 : index
    %14 = vector.load %arg5[%c0_7, %c0_8] : memref<1x128xf32, #tpu.memory_space<vmem>>, vector<1x128xf32>
    tpu.vector_store %arg5[%c0_7, %c0_8], %13 {strides = array<i32>} : memref<1x128xf32, #tpu.memory_space<vmem>>, vector<1x128xf32>,
    return
  }
  func.func @transform_0(%arg0: i32, %arg1: i32) -> (i32, i32) {
    %c0_i32 = arith.constant 0 : i32
    return %arg0, %arg1 : i32, i32
  }
  func.func @transform_1(%arg0: i32, %arg1: i32) -> (i32, i32) {
    %c0_i32 = arith.constant 0 : i32
    return %arg0, %arg1 : i32, i32
  }
  func.func @transform_2(%arg0: i32, %arg1: i32) -> (i32, i32) {
    %c0_i32 = arith.constant 0 : i32
    %c0_i32_0 = arith.constant 0 : i32
    return %c0_i32, %arg1 : i32, i32
  }
  func.func @transform_3(%arg0: i32, %arg1: i32) -> (i32, i32) {
    %c0_i32 = arith.constant 0 : i32
    return %arg0, %arg1 : i32, i32
  }
}

</mosaic_0001>

<bundles_post_ra>
// kernel: categorical_transform_forward.1
= control target key start
LH: loop header
LB: loop body
LE: loop exit
PB: predicated region body
PF: predicated region fallthrough
CT: control target
= control target key end

     0   :  { %s81_s0 = inlined_call_operand.vmem [shape: f32[1,128], index: 0, kind: input, shape index: {}]   ;;  %s82_s1 = inlined_call_operand.vmem [shape: f32[1,128], index: 1, kind: input, shape index: {}]   ;;  %s83_s2 = inlined_call_operand.vmem [shape: f32[1,128], index: 2, kind: input, shape index: {}]   ;;  %s84_s3 = inlined_call_operand.vmem [shape: f32[1,128], index: 3, kind: output, shape index: {}]  }
   0x1   :  { %v14_v0 = vld [vmem:[%s81_s0] sm:$0x1] }
   0x2   :  { %v15_v1 = vld [vmem:[%s83_s2] sm:$0x1] }
   0x3   :  { %v16_v2 = vld [vmem:[%s82_s1] sm:$0x1]  ;;  %vm38_vm4 = vcmp.gt.f32.partialorder %v15_v1, 0.0 }
   0x4   :  { %v17_v3 = vadd.f32 %v16_v2, %v14_v0 }
   0x6   :  { %v18_v4 = vmul.f32 %v17_v3, %v15_v1 }
   0x8   :  { %v19_v5 = vadd.f32 1e-06, %v18_v4 }
   0xa   :  { %v20_v6 = vsub.f32 1.0, %v19_v5 }
   0xc   :  { %45 = vrcp.f32 %v20_v6  ;;  %v32_v9 = vand.u32 2147483648, %v20_v6  ;;  %vm26_vm0 = vweird.f32 %v20_v6  ;;  %v30_v11 = vand.u32 2147483647, %v20_v6 }
   0xe   :  { %v33_v13 = vor.u32 1.1754944e-38, %v32_v9  ;;  %vm31_vm3 = vcmp.eq.f32.partialorder %v30_v11, 8.507059e+37 }
  0x12   :  { %v46_v7 = vpop.eup %45 }
  0x13   :  { %v22_v8 = vmul.f32 %v46_v7, %v20_v6  ;;  %vm27_vm1 = vweird.f32 %v46_v7 }
  0x14   :  { %vm28_vm2 = vmor %vm26_vm0, %vm27_vm1 }
  0x15   :  { %v23_v10 = vsub.f32 1.0, %v22_v8 }
  0x17   :  { %v24_v12 = vmul.f32 %v46_v7, %v23_v10 }
  0x19   :  { %v25_v14 = vadd.f32 %v46_v7, %v24_v12 }
  0x1b   :  { %v29_v15 = vsel %vm28_vm2, %v46_v7, %v25_v14 }
  0x1c   :  { %v34_v16 = vsel %vm31_vm3, %v33_v13, %v29_v15 }
  0x1d   :  { %v35_v17 = vmul.f32 %v34_v16, %v19_v5 }
  0x1f   :  { %47 = vlog2.f32 %v35_v17 }
  0x25   :  { %v48_v18 = vpop.eup %47 }
  0x26   :  { %v37_v19 = vmul.f32 0.6931472, %v48_v18 }
  0x28   :  { %v39_v20 = vsel %vm38_vm4, %v37_v19, %v14_v0 }
  0x29   :  { %40 = vst [vmem:[%s84_s3] sm:$0x1] %v39_v20 }

</bundles_post_ra>
